<compile_context>
chip_gen: v5e
topology: v5e:2x2
jax: 0.10.0
libtpu: 0.0.40
codegen_flags: <defaults>
</compile_context>

<pallas_src>
import math
from functools import partial, lru_cache

import jax
import jax.numpy as jnp
from jax.experimental import pallas as pl
from jax.experimental.pallas import tpu as pltpu

_LANE = 128


# ------------------------- generation-aware budgets ---------------------------

@lru_cache(maxsize=None)
def _vmem_capacity_bytes():
    """Physical VMEM per core; falls back to the smallest (v7x, 64 MiB)."""
    try:
        cap = getattr(pltpu.get_tpu_info(), "vmem_capacity_bytes", None)
        if cap:
            return int(min(max(int(cap), 64 * 1024 * 1024), 128 * 1024 * 1024))
    except Exception:
        pass
    return 64 * 1024 * 1024


def _vmem_limit_bytes():
    # ~80% of physical: ~51 MiB on v7x (64 MiB), ~102 MiB on v5e/v6e (128 MiB).
    return int(_vmem_capacity_bytes() * 8 // 10)


# ------------------------------- kernels ------------------------------------

def _fused_quant_kernel(x_ref, o_ref, *, n_levels):
    """Whole tensor resident in VMEM: min/max + quantize, 1 read + 1 write."""
    x = x_ref[...].astype(jnp.float32)
    mn = jnp.min(x)
    mx = jnp.max(x)
    rng = mx - mn
    # NOTE: rng == 0 (constant input) yields inf/nan, matching PyTorch
    # min_max_quantize semantics (no extra guard added on purpose).
    scale = n_levels / rng
    step = rng / n_levels
    o_ref[...] = (jnp.floor((x - mn) * scale + 0.5) * step + mn).astype(o_ref.dtype)


def _stats_row(mn, mx):
    """Pack [mn | -mx] into one lane-dense (1, 128) row (single unmasked vst)."""
    lane = jax.lax.broadcasted_iota(jnp.int32, (1, _LANE), 1)
    return jnp.where(lane < _LANE // 2, mn, -mx)


def _partial_minmax_kernel(x_ref, stats_ref, *, valid_rows_last):
    """Per-block partial min/max.  The ragged-row mask runs only on the LAST
    grid block, so every other block is a bare (HBM-bound) min/max."""
    x = x_ref[...].astype(jnp.float32)
    tile_rows = x.shape[0]                      # static block shape
    if valid_rows_last == tile_rows:            # static: no ragged tail at all
        stats_ref[...] = _stats_row(jnp.min(x), jnp.max(x))
    else:
        last = pl.num_programs(0) - 1
        i = pl.program_id(0)

        @pl.when(i != last)
        def _():
            stats_ref[...] = _stats_row(jnp.min(x), jnp.max(x))

        @pl.when(i == last)
        def _():
            row = jax.lax.broadcasted_iota(jnp.int32, x.shape, 0)
            valid = row < valid_rows_last       # mask rows past the ragged tail
            mn = jnp.min(jnp.where(valid, x, jnp.inf))
            mx = jnp.max(jnp.where(valid, x, -jnp.inf))
            stats_ref[...] = _stats_row(mn, mx)


def _quant_kernel(stats_ref, x_ref, o_ref, *, n_levels):
    """Element-wise quantization with hoisted scalar math (no per-elem div).
    We keep floor((x - mn) * scale + 0.5) (rather than folding mn into the
    additive constant) to stay faithful to min_max_quantize's rounding
    boundaries.  OOB writes of the last ragged block are dropped by Pallas."""
    mn = stats_ref[0, 0]
    mx = stats_ref[0, 1]
    rng = mx - mn
    scale = n_levels / rng
    step = rng / n_levels
    x = x_ref[...].astype(jnp.float32)
    o_ref[...] = (jnp.floor((x - mn) * scale + 0.5) * step + mn).astype(o_ref.dtype)


def _sign_kernel(x_ref, o_ref):
    x = x_ref[...].astype(jnp.float32)
    o_ref[...] = (jnp.sign(x) - 1.0).astype(o_ref.dtype)


# ------------------------------- wrapper -------------------------------------

def _cdiv(a, b):
    return -(-a // b)


def _choose_width(total):
    """Widest lane-dense last dim (multiple of 128) that divides `total`."""
    for w in (2048, 1024, 512, 256, 128):
        if total % w == 0:
            return w
    return _LANE  # unreachable: total is always a multiple of 128 here


def _sublane_multiple(itemsize):
    # Native sublane packing: f32 -> 8, bf16/f16 -> 16, int8/fp8 -> 32.
    return 8 * max(1, 4 // max(1, itemsize))


def _pick_tile_rows(rows, width, itemsize, tile_bytes, sub):
    """Largest sublane-aligned row tile of ~tile_bytes; full array if smaller."""
    row_bytes = width * itemsize
    tr = max(sub, (max(tile_bytes, row_bytes * sub) // row_bytes) // sub * sub)
    if tr >= rows:
        return rows            # single block; block dim == full dim is legal
    return tr


def normal_quant_forward(x, bits, *, tile_bytes=None, fused_max_bytes=None):
    """NormalQuant.forward with quant_func = min_max_quantize (bits static)."""
    assert bits >= 1, bits
    orig_shape = x.shape
    dtype = x.dtype
    itemsize = dtype.itemsize
    total = int(x.size)

    vmem_limit = _vmem_limit_bytes()
    cparams = pltpu.CompilerParams(dimension_semantics=("parallel",),
                                   vmem_limit_bytes=vmem_limit)

    # Lane-dense 2-D view in the native dtype.  Zero-copy when the element
    # count is a multiple of 128 (the common case for NN tensors).
    xf = x.reshape(-1)
    pad = (-total) % _LANE
    if pad:
        # TODO(synk): handle the <=127-element tail in-kernel instead of these
        # full-tensor pad/slice copies (only hit when total % 128 != 0).
        xf = jnp.pad(xf, (0, pad), mode="edge")   # edge values keep min/max
    padded_total = total + pad
    width = _choose_width(padded_total)
    rows = padded_total // width
    x2 = xf.reshape(rows, width)

    nbytes = padded_total * itemsize
    n_levels = float(math.pow(2.0, bits) - 1.0)
    sub = _sublane_multiple(itemsize)

    # Fused threshold: input + f32 working copy + output must fit the budget.
    if fused_max_bytes is None:
        fused_max_bytes = vmem_limit // (3 if itemsize >= 4 else 5)

    if bits > 1 and nbytes <= fused_max_bytes:
        # ------- fused single-pass path: whole tensor resident in VMEM -------
        out2 = pl.pallas_call(
            partial(_fused_quant_kernel, n_levels=n_levels),
            out_shape=jax.ShapeDtypeStruct((rows, width), dtype),
            compiler_params=pltpu.CompilerParams(vmem_limit_bytes=vmem_limit),
        )(x2)
    elif bits == 1:
        # ----- sign path: no global reduction -> always tiled & pipelined ----
        t_rows = _pick_tile_rows(rows, width, itemsize,
                                 tile_bytes or vmem_limit // 6, sub)
        num_blocks = _cdiv(rows, t_rows)
        spec = pl.BlockSpec((t_rows, width), lambda i: (i, 0))
        out2 = pl.pallas_call(
            _sign_kernel,
            grid=(num_blocks,),
            in_specs=[spec],
            out_specs=spec,
            out_shape=jax.ShapeDtypeStruct((rows, width), dtype),
            compiler_params=cparams,
        )(x2)
    else:
        # ---------------------- tiled two-pass path --------------------------
        # Pass 1: per-block partial min/max (read-only -> larger tile).
        t1 = _pick_tile_rows(rows, width, itemsize,
                             tile_bytes or vmem_limit // 4, sub)
        nb1 = _cdiv(rows, t1)
        valid_last = rows - (nb1 - 1) * t1
        stats = pl.pallas_call(
            partial(_partial_minmax_kernel, valid_rows_last=valid_last),
            grid=(nb1,),
            in_specs=[pl.BlockSpec((t1, width), lambda i: (i, 0))],
            out_specs=pl.BlockSpec((1, _LANE), lambda i: (i, 0)),
            out_shape=jax.ShapeDtypeStruct((nb1, _LANE), jnp.float32),
            compiler_params=cparams,
        )(x2)

        # Tiny final reduce of the packed per-block [mn | -mx] rows.
        red = jnp.min(stats, axis=0)                         # (128,)
        mn = jnp.min(red[:_LANE // 2])
        mx = -jnp.min(red[_LANE // 2:])
        mnmx = jnp.stack([mn, mx]).reshape(1, 2).astype(jnp.float32)

        # Pass 2: element-wise quantization (in + out double-buffered).
        t2 = _pick_tile_rows(rows, width, itemsize,
                             tile_bytes or vmem_limit // 6, sub)
        nb2 = _cdiv(rows, t2)
        spec2 = pl.BlockSpec((t2, width), lambda i: (i, 0))
        scalar_spec = pl.BlockSpec((1, 2), lambda i: (0, 0),
                                   memory_space=pltpu.SMEM)
        out2 = pl.pallas_call(
            partial(_quant_kernel, n_levels=n_levels),
            grid=(nb2,),
            in_specs=[scalar_spec, spec2],
            out_specs=spec2,
            out_shape=jax.ShapeDtypeStruct((rows, width), dtype),
            compiler_params=cparams,
        )(mnmx, x2)

    out_flat = out2.reshape(-1)
    if pad:
        out_flat = out_flat[:total]
    return out_flat.reshape(orig_shape)


# ------------------------------ reference ------------------------------------

def _reference(x, bits):
    """Pure-JAX min_max_quantize, same scalar hoisting as the kernel."""
    if bits == 1:
        return (jnp.sign(x.astype(jnp.float32)) - 1.0).astype(x.dtype)
    xf = x.astype(jnp.float32)
    mn = jnp.min(xf)
    mx = jnp.max(xf)
    n = 2.0 ** bits - 1.0
    rng = mx - mn
    v = jnp.floor((xf - mn) * (n / rng) + 0.5) * (rng / n) + mn
    return v.astype(x.dtype)


# -------------------------------- demo ---------------------------------------

if __name__ == "__main__":
    key = jax.random.PRNGKey(0)
    k1, k2, k3 = jax.random.split(key, 3)

    # 1) Module-sized NCHW input (fused single-pass path).
    x1 = jax.random.normal(k1, (2, 4, 16, 16), dtype=jnp.float32)
    out1 = jax.block_until_ready(normal_quant_forward(x1, 4))
    assert out1.shape == x1.shape and out1.dtype == x1.dtype
    assert jnp.allclose(out1, _reference(x1, 4), atol=1e-5, rtol=1e-5)

    # 2) Forced tiled two-pass path with evenly divided blocks (unmasked pass 1).
    x2 = jax.random.normal(k2, (4, 32, 32, 32), dtype=jnp.float32)
    out2 = jax.block_until_ready(
        normal_quant_forward(x2, 4, tile_bytes=128 * 1024, fused_max_bytes=0))
    assert jnp.allclose(out2, _reference(x2, 4), atol=1e-5, rtol=1e-5)

    # 3) Ragged last block: exercises the last-block-only tail masking.
    x3 = jax.random.normal(k3, (3, 32, 32, 32), dtype=jnp.float32)
    out3 = jax.block_until_ready(
        normal_quant_forward(x3, 5, tile_bytes=256 * 1024, fused_max_bytes=0))
    assert jnp.allclose(out3, _reference(x3, 5), atol=1e-5, rtol=1e-5)

    # 4) bits == 1 (sign) path: always tiled & pipelined.
    out4 = jax.block_until_ready(normal_quant_forward(x1, 1))
    assert jnp.allclose(out4, _reference(x1, 1))

    # 5) Native bf16 dtype stays bf16 end-to-end (16-row sublane packing).
    x5 = x1.astype(jnp.bfloat16)
    out5 = jax.block_until_ready(normal_quant_forward(x5, 3))
    assert out5.dtype == jnp.bfloat16
    assert jnp.allclose(out5.astype(jnp.float32),
                        _reference(x5, 3).astype(jnp.float32),
                        atol=1e-2, rtol=1e-2)

    print("KERNEL_OK")
</pallas_src>

<mosaic_0001>
module attributes {stable_mosaic.version = 11 : i64} {
  func.func @_fused_quant_kernel(%arg0: memref<1x2048xf32, #tpu.memory_space<vmem>>, %arg1: memref<1x2048xf32, #tpu.memory_space<vmem>>) attributes {dimension_semantics = [], scalar_prefetch = 0 : i64, scratch_operands = 0 : i64, tpu.core_type = #tpu.core_type<tc>} {
    %c0 = arith.constant 0 : index
    %c0_0 = arith.constant 0 : index
    %0 = vector.load %arg0[%c0, %c0_0] : memref<1x2048xf32, #tpu.memory_space<vmem>>, vector<1x2048xf32>
    %1 = vector.shape_cast %0 : vector<1x2048xf32> to vector<1x1x2048xf32>
    %cst = arith.constant dense<0x7F800000> : vector<1xf32>
    %2 = vector.multi_reduction <minimumf>, %1, %cst [1, 2] : vector<1x1x2048xf32> to vector<1xf32>
    %3 = vector.shape_cast %2 : vector<1xf32> to vector<1x1x1xf32>
    %4 = vector.extract %3[0, 0, 0] : f32 from vector<1x1x1xf32>
    %5 = vector.shape_cast %0 : vector<1x2048xf32> to vector<1x1x2048xf32>
    %cst_1 = arith.constant dense<0xFF800000> : vector<1xf32>
    %6 = vector.multi_reduction <maximumf>, %5, %cst_1 [1, 2] : vector<1x1x2048xf32> to vector<1xf32>
    %7 = vector.shape_cast %6 : vector<1xf32> to vector<1x1x1xf32>
    %8 = vector.extract %7[0, 0, 0] : f32 from vector<1x1x1xf32>
    %9 = arith.subf %8, %4 : f32
    %cst_2 = arith.constant 1.500000e+01 : f32
    %10 = arith.divf %cst_2, %9 : f32
    %cst_3 = arith.constant 1.500000e+01 : f32
    %11 = arith.divf %9, %cst_3 : f32
    %12 = vector.broadcast %4 : f32 to vector<1x2048xf32>
    %13 = arith.subf %0, %12 : vector<1x2048xf32>
    %14 = vector.broadcast %10 : f32 to vector<1x2048xf32>
    %15 = arith.mulf %13, %14 : vector<1x2048xf32>
    %cst_4 = arith.constant 5.000000e-01 : f32
    %16 = vector.broadcast %cst_4 : f32 to vector<1x2048xf32>
    %17 = arith.addf %15, %16 : vector<1x2048xf32>
    %18 = math.floor %17 : vector<1x2048xf32>
    %19 = vector.broadcast %11 : f32 to vector<1x2048xf32>
    %20 = arith.mulf %18, %19 : vector<1x2048xf32>
    %21 = vector.broadcast %4 : f32 to vector<1x2048xf32>
    %22 = arith.addf %20, %21 : vector<1x2048xf32>
    %c0_5 = arith.constant 0 : index
    %c0_6 = arith.constant 0 : index
    %23 = vector.load %arg1[%c0_5, %c0_6] : memref<1x2048xf32, #tpu.memory_space<vmem>>, vector<1x2048xf32>
    tpu.vector_store %arg1[%c0_5, %c0_6], %22 {strides = array<i32>} : memref<1x2048xf32, #tpu.memory_space<vmem>>, vector<1x2048xf32>,
    return
  }
}

</mosaic_0001>

<bundles_post_ra>
// kernel: tpu_custom_call.1
= control target key start
LH: loop header
LB: loop body
LE: loop exit
PB: predicated region body
PF: predicated region fallthrough
CT: control target
= control target key end

     0   :  { %6 = vsyncpa [#allocation3], 0  ;;  %s345_s0 = inlined_call_operand.hbm [shape: f32[1,2048], index: 0, kind: input, shape index: {}]   ;;  %s346_s1 = inlined_call_operand.hbm [shape: f32[1,2048], index: 1, kind: output, shape index: {}]  }
   0x1   :  { %7 = vsyncpa [#allocation4], 0  ;;  %s13_s8 = sshll.u32 %s345_s0, 4  ;;  %s268_s9 = smov [#allocation2]   ;;  %s14_s8 = int_to_ptr.hbm [resolvable:$true] %s13_s8 }
   0x2   :  { %s15_s10 = sshll.u32 %s268_s9, 4  ;;  %s16_s10 = int_to_ptr.vmem [resolvable:$true] %s15_s10 }
   0x3   :  { %18 = dma.hbm_to_vmem [thread:$0]  %s14_s8, 256, %s16_s10, [#allocation3]  }
   0x4   :  { %264 = dma.done.wait [#allocation3], 256  }
   0x5   :  { %265 = vsyncadd [#allocation3], 4294967040  ;;  %v284_v0 = vld [vmem:[#allocation2] sm:$0xff]  ;;  %v286_v1 = vld [vmem:[#allocation2 + $0x8] sm:$0xff]  ;;  %vm59_vm0 = vcmask 1040384   ;;  %s270_s17 = smov [#allocation5]  }
   0x6   :  { %v27_v2 = vperm.slane %v284_v0, 0  ;;  %v28_v3 = vperm.slane %v284_v0, 1  ;;  %v29_v4 = vperm.slane %v284_v0, 2  ;;  %v30_v5 = vperm.slane %v284_v0, 3  ;;  %s189_s18 = sshll.u32 %s270_s17, 4  ;;  %s191_s21 = sshll.u32 %s346_s1, 4  ;;  %s190_s18 = int_to_ptr.vmem [resolvable:$true] %s189_s18  ;;  %s192_s21 = int_to_ptr.hbm [resolvable:$true] %s191_s21 }
   0x7   :  { %v31_v6 = vperm.slane %v284_v0, 4  ;;  %v32_v7 = vperm.slane %v284_v0, 5  ;;  %v33_v8 = vperm.slane %v284_v0, 6  ;;  %v34_v9 = vperm.slane %v284_v0, 7 }
   0x8   :  { %v35_v10 = vperm.slane %v286_v1, 0  ;;  %v36_v11 = vperm.slane %v286_v1, 1  ;;  %v37_v12 = vperm.slane %v286_v1, 2  ;;  %v38_v13 = vperm.slane %v286_v1, 3 }
   0x9   :  { %v39_v14 = vperm.slane %v286_v1, 4  ;;  %v40_v15 = vperm.slane %v286_v1, 5  ;;  %v41_v16 = vperm.slane %v286_v1, 6  ;;  %v42_v17 = vperm.slane %v286_v1, 7 }
   0xa   :  { %v60_v18 = vsel %vm59_vm0, %v27_v2, inf  ;;  %v61_v19 = vsel %vm59_vm0, %v28_v3, inf  ;;  %v62_v20 = vsel %vm59_vm0, %v29_v4, inf  ;;  %v63_v21 = vsel %vm59_vm0, %v30_v5, inf }
   0xb   :  { %v64_v22 = vsel %vm59_vm0, %v31_v6, inf  ;;  %v66_v23 = vsel %vm59_vm0, %v32_v7, inf  ;;  %v68_v24 = vsel %vm59_vm0, %v33_v8, inf  ;;  %v70_v25 = vsel %vm59_vm0, %v34_v9, inf }
   0xc   :  { %v65_v26 = vmin.f32 %v60_v18, %v64_v22  ;;  %v67_v27 = vmin.f32 %v61_v19, %v66_v23  ;;  %v69_v28 = vmin.f32 %v62_v20, %v68_v24  ;;  %v71_v29 = vmin.f32 %v63_v21, %v70_v25 }
   0xd   :  { %v72_v30 = vsel %vm59_vm0, %v35_v10, inf  ;;  %v74_v31 = vsel %vm59_vm0, %v36_v11, inf  ;;  %v76_v32 = vsel %vm59_vm0, %v37_v12, inf  ;;  %v78_v33 = vsel %vm59_vm0, %v38_v13, inf }
   0xe   :  { %v73_v34 = vmin.f32 %v65_v26, %v72_v30  ;;  %v75_v35 = vmin.f32 %v67_v27, %v74_v31  ;;  %v77_v36 = vmin.f32 %v69_v28, %v76_v32  ;;  %v79_v37 = vmin.f32 %v71_v29, %v78_v33 }
   0xf   :  { %v80_v38 = vsel %vm59_vm0, %v39_v14, inf  ;;  %v82_v39 = vsel %vm59_vm0, %v40_v15, inf  ;;  %v84_v40 = vsel %vm59_vm0, %v41_v16, inf  ;;  %v86_v41 = vsel %vm59_vm0, %v42_v17, inf }
  0x10   :  { %v81_v42 = vmin.f32 %v73_v34, %v80_v38  ;;  %v83_v43 = vmin.f32 %v75_v35, %v82_v39  ;;  %v85_v44 = vmin.f32 %v77_v36, %v84_v40  ;;  %v87_v45 = vmin.f32 %v79_v37, %v86_v41 }
  0x11   :  { %v100_v46 = vsel %vm59_vm0, %v27_v2, -inf  ;;  %v101_v47 = vsel %vm59_vm0, %v28_v3, -inf  ;;  %v102_v48 = vsel %vm59_vm0, %v29_v4, -inf  ;;  %v103_v49 = vsel %vm59_vm0, %v30_v5, -inf }
  0x12   :  { %v88_v50 = vmin.f32 %v81_v42, %v83_v43  ;;  %v89_v51 = vmin.f32 %v85_v44, %v87_v45  ;;  %v104_v52 = vsel %vm59_vm0, %v31_v6, -inf  ;;  %v106_v53 = vsel %vm59_vm0, %v32_v7, -inf }
  0x13   :  { %v105_v54 = vmax.f32 %v100_v46, %v104_v52  ;;  %v107_v55 = vmax.f32 %v101_v47, %v106_v53  ;;  %v108_v56 = vsel %vm59_vm0, %v33_v8, -inf  ;;  %v110_v57 = vsel %vm59_vm0, %v34_v9, -inf }
  0x14   :  { %v90_v58 = vmin.f32 %v88_v50, %v89_v51  ;;  %v109_v59 = vmax.f32 %v102_v48, %v108_v56  ;;  %v111_v60 = vmax.f32 %v103_v49, %v110_v57  ;;  %v112_v61 = vsel %vm59_vm0, %v35_v10, -inf }
  0x15   :  { %v113_v62 = vmax.f32 %v105_v54, %v112_v61  ;;  %v114_v63 = vsel %vm59_vm0, %v36_v11, -inf  ;;  %v116_v2 = vsel %vm59_vm0, %v37_v12, -inf  ;;  %v118_v3 = vsel %vm59_vm0, %v38_v13, -inf }
  0x16   :  { %91 = vmin.xlane.f32.xlu0 %v90_v58  ;;  %v115_v4 = vmax.f32 %v107_v55, %v114_v63  ;;  %v117_v5 = vmax.f32 %v109_v59, %v116_v2  ;;  %v119_v6 = vmax.f32 %v111_v60, %v118_v3  ;;  %v120_v7 = vsel %vm59_vm0, %v39_v14, -inf }
  0x17   :  { %v121_v8 = vmax.f32 %v113_v62, %v120_v7  ;;  %v122_v9 = vsel %vm59_vm0, %v40_v15, -inf  ;;  %v124_v18 = vsel %vm59_vm0, %v41_v16, -inf  ;;  %v126_v10 = vsel %vm59_vm0, %v42_v17, -inf }
  0x18   :  { %v123_v19 = vmax.f32 %v115_v4, %v122_v9  ;;  %v125_v20 = vmax.f32 %v117_v5, %v124_v18  ;;  %v127_v11 = vmax.f32 %v119_v6, %v126_v10  ;;  %v269_v32 = vmov 15.0  }
  0x19   :  { %212 = vrcp.f32 %v269_v32 }
  0x1a   :  { %v128_v21 = vmax.f32 %v121_v8, %v123_v19  ;;  %v129_v12 = vmax.f32 %v125_v20, %v127_v11 }
  0x1c   :  { %v130_v22 = vmax.f32 %v128_v21, %v129_v12 }
  0x1e   :  { %131 = vmax.xlane.f32.xlu0 %v130_v22 }
  0x1f   :  { %v213_v33 = vpop.eup %212 }
  0x20   :  { %v159_v35 = vmul.f32 15.0, %v213_v33  ;;  %vm163_vm2 = vweird.f32 %v213_v33 }
  0x22   :  { %v160_v36 = vsub.f32 1.0, %v159_v35 }
  0x24   :  { %v161_v39 = vmul.f32 %v213_v33, %v160_v36 }
  0x26   :  { %v162_v44 = vadd.f32 %v213_v33, %v161_v39 }
  0x28   :  { %v164_v48 = vsel %vm163_vm2, %v213_v33, %v162_v44 }
  0x89   :  { %v92_v13 = vpop.xlane.xlu0 %91 }
  0x8a   :  { %v93_v23 = vrot.slane %v92_v13, 4 }
  0x8c   :  { %v94_v24 = vmin.f32 %v92_v13, %v93_v23 }
  0x8e   :  { %v95_v25 = vrot.slane %v94_v24, 2 }
  0x90   :  { %v96_v26 = vmin.f32 %v94_v24, %v95_v25 }
  0x91   :  { %v132_v14 = vpop.xlane.xlu0 %131 }
  0x92   :  { %v133_v27 = vrot.slane %v132_v14, 4  ;;  %v97_v28 = vrot.slane %v96_v26, 1 }
  0x94   :  { %v134_v15 = vmax.f32 %v132_v14, %v133_v27  ;;  %v98_v29 = vmin.f32 %v96_v26, %v97_v28 }
  0x96   :  { %v135_v16 = vrot.slane %v134_v15, 2  ;;  %201 = vpush %v98_v29 }
  0x98   :  { %v136_v17 = vmax.f32 %v134_v15, %v135_v16 }
  0x9a   :  { %v137_v30 = vrot.slane %v136_v17, 1 }
  0x9c   :  { %v138_v31 = vmax.f32 %v136_v17, %v137_v30 }
  0x9e   :  { %203 = vpush %v138_v31 }
  0xc7   :  { %s202_s0 = spop %201 }
  0xc8   :  { %v167_v50 = vstv %s202_s0 }
  0xc9   :  { %v168_v51 = vsub.f32 %v284_v0, %v167_v50  ;;  %v169_v52 = vsub.f32 %v286_v1, %v167_v50 }
  0xcf   :  { %s204_s11 = spop %203 }
  0xd0   :  { %s336_s12 = ssub.f32 %s204_s11, %s202_s0 }
  0xd2   :  { %v141_v34 = vstv %s336_s12 }
  0xd3   :  { %214 = vrcp.f32 %v141_v34  ;;  %v153_v41 = vand.u32 2147483648, %v141_v34  ;;  %v151_v43 = vand.u32 2147483647, %v141_v34  ;;  %vm147_vm3 = vweird.f32 %v141_v34 }
  0xd5   :  { %v154_v46 = vor.u32 1.1754944e-38, %v153_v41  ;;  %vm152_vm5 = vcmp.eq.f32.partialorder %v151_v43, 8.507059e+37 }
  0xd9   :  { %v215_v37 = vpop.eup %214 }
  0xda   :  { %v143_v38 = vmul.f32 %v215_v37, %v141_v34  ;;  %vm148_vm1 = vweird.f32 %v215_v37 }
  0xdb   :  { %vm149_vm4 = vmor %vm147_vm3, %vm148_vm1 }
  0xdc   :  { %v144_v40 = vsub.f32 1.0, %v143_v38 }
  0xde   :  { %v145_v42 = vmul.f32 %v215_v37, %v144_v40 }
  0xe0   :  { %v146_v45 = vadd.f32 %v215_v37, %v145_v42 }
  0xe2   :  { %v150_v47 = vsel %vm149_vm4, %v215_v37, %v146_v45 }
  0xe3   :  { %v155_v49 = vsel %vm152_vm5, %v154_v46, %v150_v47 }
  0xe4   :  { %205 = vpush %v155_v49 }
  0xe5   :  { %207 = vpush %v164_v48 }
 0x115   :  { %s206_s13 = spop %205 }
 0x116   :  { %s157_s14 = smul.f32 15.0, %s206_s13  ;;  %s208_s15 = spop %207 }
 0x117   :  { %s166_s16 = smul.f32 %s208_s15, %s336_s12 }
 0x118   :  { %v170_v53 = vstv %s157_s14 }
 0x119   :  { %v171_v54 = vmul.f32 %v170_v53, %v168_v51  ;;  %v172_v55 = vmul.f32 %v170_v53, %v169_v52  ;;  %v177_v60 = vstv %s166_s16 }
 0x11b   :  { %v173_v56 = vadd.f32 0.5, %v171_v54  ;;  %v174_v57 = vadd.f32 0.5, %v172_v55 }
 0x11d   :  { %v175_v58 = vfloor.f32 %v173_v56  ;;  %v176_v59 = vfloor.f32 %v174_v57 }
 0x11f   :  { %v178_v61 = vmul.f32 %v177_v60, %v175_v58  ;;  %v179_v62 = vmul.f32 %v177_v60, %v176_v59 }
 0x121   :  { %v180_v0 = vadd.f32 %v178_v61, %v167_v50  ;;  %v181_v1 = vadd.f32 %v179_v62, %v167_v50 }
 0x123   :  { %182 = vst [vmem:[#allocation5] sm:$0xff] %v180_v0 }
 0x124   :  { %183 = vst [vmem:[#allocation5 + $0x8] sm:$0xff] %v181_v1 }
 0x125   :  { %194 = dma.vmem_to_hbm [thread:$0]  %s190_s18, 256, %s192_s21, [#allocation4]  }
 0x126   :  { %266 = dma.done.wait [#allocation4], 256  }
 0x127   :  { %267 = vsyncadd [#allocation4], 4294967040 }
 0x128   :  { %199 = vsyncpa [#allocation3], 1 }
 0x129   :  { %200 = vsyncpa [#allocation4], 1 }

</bundles_post_ra>
